<compile_context>
chip_gen: v7x
topology: tpu7x:2x2x1
jax: 0.10.0
libtpu: 0.0.40
codegen_flags: <defaults>
</compile_context>

<pallas_src>
import jax
import jax.numpy as jnp
from jax.experimental import pallas as pl
from jax.experimental.pallas import tpu as pltpu


def _round_up(n, m):
    return ((n + m - 1) // m) * m


def basic_block_kernel(x_ref,
                       w1_ref, ba1_ref,
                       w2_ref, ba2_ref,
                       w3_ref, ba3_ref,
                       out_ref):
    # x tile arrives at its HBM dtype; cast to bf16 only for the MXU
    # (no-op if the caller already supplied bf16).
    x = x_ref[...].astype(jnp.bfloat16)

    ba1 = ba1_ref[...]            # (2, Fp) f32: row 0 = bias, row 1 = prelu alpha
    ba2 = ba2_ref[...]            # (2, Hp)
    ba3 = ba3_ref[...]            # (2, Fp)
    b1, a1 = ba1[0:1, :], ba1[1:2, :]
    b2, a2 = ba2[0:1, :], ba2[1:2, :]
    b3, a3 = ba3[0:1, :], ba3[1:2, :]

    # fcn1 + PReLU1  (bf16 x bf16 -> f32 accumulate)
    y1 = jnp.dot(x, w1_ref[...], preferred_element_type=jnp.float32) + b1
    x1 = jnp.where(y1 >= 0, y1, a1 * y1)                      # f32, kept for residual

    # fcn2 + PReLU2
    y2 = jnp.dot(x1.astype(jnp.bfloat16), w2_ref[...],
                 preferred_element_type=jnp.float32) + b2
    h = jnp.where(y2 >= 0, y2, a2 * y2)

    # fcn3 + PReLU3 + residual add of x1
    y3 = jnp.dot(h.astype(jnp.bfloat16), w3_ref[...],
                 preferred_element_type=jnp.float32) + b3
    out = jnp.where(y3 >= 0, y3, a3 * y3) + x1

    # Store only the real feature columns (zero-padded lanes are exactly zero
    # thanks to zero-padded W / b / alpha, so dropping them is exact).
    n_out = out_ref.shape[1]
    out_ref[...] = out[:, :n_out].astype(out_ref.dtype)


def basic_block(x, params, *, block_b=None):
    """x: [B, in_feature] float32 or bfloat16.  params: dict (see init_params)."""
    B, in_feature = x.shape
    out_feature = params["w1"].shape[0]
    hidden = params["w2"].shape[0]

    # ---- lane-dense padding of the feature dims for COMPUTE only ------------
    Fp = _round_up(out_feature, 128)
    Hp = _round_up(hidden, 128)

    def pad_vec(v, n):
        return jnp.pad(v, (0, n - v.shape[0]))

    # PyTorch Linear stores [out, in]; kernel wants [in, out]; pad with zeros.
    w1t = jnp.pad(params["w1"].T, ((0, 0), (0, Fp - out_feature))).astype(jnp.bfloat16)
    w2t = jnp.pad(params["w2"].T, ((0, Fp - out_feature), (0, Hp - hidden))).astype(jnp.bfloat16)
    w3t = jnp.pad(params["w3"].T, ((0, Hp - hidden), (0, Fp - out_feature))).astype(jnp.bfloat16)

    ba1 = jnp.stack([pad_vec(params["b1"], Fp), pad_vec(params["a1"], Fp)]).astype(jnp.float32)
    ba2 = jnp.stack([pad_vec(params["b2"], Hp), pad_vec(params["a2"], Hp)]).astype(jnp.float32)
    ba3 = jnp.stack([pad_vec(params["b3"], Fp), pad_vec(params["a3"], Fp)]).astype(jnp.float32)

    # ---- batch tiling --------------------------------------------------------
    if block_b is None:
        target = 1024                                 # amortise ~0.35 us/step
        half = _round_up(pl.cdiv(B, 2), 8)            # >= 2 steps -> both v7x TCs busy
        block_b = max(8, min(target, half))
    block_b = max(8, _round_up(block_b, 8))
    B_pad = _round_up(B, block_b)
    x_p = jnp.pad(x, ((0, B_pad - B), (0, 0))) if B_pad != B else x
    grid = (B_pad // block_b,)

    # x / out tiled over the batch axis; parameters replicated (constant block
    # index -> stay resident in VMEM, no re-DMA per step).
    x_spec = pl.BlockSpec((block_b, in_feature), lambda i: (i, 0))
    out_spec = pl.BlockSpec((block_b, out_feature), lambda i: (i, 0))

    def rep(shape):
        return pl.BlockSpec(shape, lambda i: (0, 0))

    # ---- VMEM budget / cost estimate ----------------------------------------
    itemsize = jnp.dtype(x.dtype).itemsize
    weight_bytes = (w1t.size + w2t.size + w3t.size) * 2
    ba_bytes = (ba1.size + ba2.size + ba3.size) * 4
    interm_bytes = block_b * (in_feature * 2              # bf16 copy of x
                              + 6 * max(Fp, Hp) * 4       # f32 intermediates
                              + 2 * (Fp + Hp) * 2)        # bf16 re-casts
    vmem_est = (2 * block_b * in_feature * itemsize        # x double buffer
                + 2 * block_b * out_feature * itemsize     # out double buffer
                + 2 * weight_bytes + 2 * ba_bytes
                + interm_bytes)
    # No artificial 16 MiB floor; 2x headroom, capped at 32 MiB (v7x-safe).
    vmem_limit = int(min(max(2 * vmem_est, 8 << 20), 32 << 20))

    flops = 2 * B_pad * (in_feature * Fp + Fp * Hp + Hp * Fp)
    bytes_accessed = (x_p.size * itemsize
                      + B_pad * out_feature * itemsize
                      + weight_bytes + ba_bytes)
    cost = pl.CostEstimate(flops=flops, transcendentals=0,
                           bytes_accessed=bytes_accessed)

    out_full = pl.pallas_call(
        basic_block_kernel,
        out_shape=jax.ShapeDtypeStruct((B_pad, out_feature), x.dtype),
        grid_spec=pltpu.PrefetchScalarGridSpec(
            num_scalar_prefetch=0,
            grid=grid,
            in_specs=[
                x_spec,
                rep(w1t.shape), rep(ba1.shape),
                rep(w2t.shape), rep(ba2.shape),
                rep(w3t.shape), rep(ba3.shape),
            ],
            out_specs=out_spec,
        ),
        compiler_params=pltpu.CompilerParams(
            dimension_semantics=("parallel",),
            vmem_limit_bytes=vmem_limit),
        cost_estimate=cost,
    )(x_p, w1t, ba1, w2t, ba2, w3t, ba3)

    return out_full if B_pad == B else out_full[:B]


def init_params(key, in_feature, hidden, out_feature, dtype=jnp.float32):
    """Deterministic synthetic init (PyTorch-like uniform for Linear, 0.25 for PReLU)."""
    ks = jax.random.split(key, 6)

    def linear(kw, kb, fan_in, fan_out):
        bound = 1.0 / jnp.sqrt(fan_in)
        w = jax.random.uniform(kw, (fan_out, fan_in), dtype, -bound, bound)
        b = jax.random.uniform(kb, (fan_out,), dtype, -bound, bound)
        return w, b

    w1, b1 = linear(ks[0], ks[1], in_feature, out_feature)
    w2, b2 = linear(ks[2], ks[3], out_feature, hidden)
    w3, b3 = linear(ks[4], ks[5], hidden, out_feature)
    return {
        "w1": w1, "b1": b1, "a1": jnp.full((out_feature,), 0.25, dtype),
        "w2": w2, "b2": b2, "a2": jnp.full((hidden,), 0.25, dtype),
        "w3": w3, "b3": b3, "a3": jnp.full((out_feature,), 0.25, dtype),
    }


def basic_block_ref(x, p):
    """Pure-JAX f32 reference for correctness check."""
    def prelu(v, a):
        return jnp.where(v >= 0, v, a * v)
    x1 = prelu(x @ p["w1"].T + p["b1"], p["a1"])
    h = prelu(x1 @ p["w2"].T + p["b2"], p["a2"])
    return prelu(h @ p["w3"].T + p["b3"], p["a3"]) + x1


if __name__ == "__main__":
    # Module-default feature dims (in=400, hidden=128, out=12); small batch.
    # Default block_b logic picks 32 rows/step -> grid = (2,) parallel steps.
    B, in_feature, hidden, out_feature = 64, 400, 128, 12

    key = jax.random.PRNGKey(0)
    kx, kp = jax.random.split(key)
    x = jax.random.normal(kx, (B, in_feature), jnp.float32)
    params = init_params(kp, in_feature, hidden, out_feature)

    out = basic_block(x, params)
    out = jax.block_until_ready(out)

    ref = basic_block_ref(x, params)
    assert out.shape == (B, out_feature)
    # bf16 matmul inputs with f32 accumulation -> tolerance loosened vs pure f32.
    assert jnp.allclose(out, ref, atol=5e-2, rtol=5e-2), (
        "mismatch vs reference, max abs err = "
        f"{float(jnp.max(jnp.abs(out - ref)))}")

    # bf16-x fast path (halves the dominant HBM input stream); output is bf16.
    out_bf16 = jax.block_until_ready(basic_block(x.astype(jnp.bfloat16), params))
    assert out_bf16.shape == (B, out_feature)
    assert bool(jnp.all(jnp.isfinite(out_bf16.astype(jnp.float32))))

    print("KERNEL_OK")
</pallas_src>

<mosaic_0001>
module attributes {stable_mosaic.version = 11 : i64} {
  func.func @basic_block_kernel(%arg0: i32, %arg1: memref<32x400xf32, #tpu.memory_space<vmem>>, %arg2: memref<400x128xbf16, #tpu.memory_space<vmem>>, %arg3: memref<2x128xf32, #tpu.memory_space<vmem>>, %arg4: memref<128x128xbf16, #tpu.memory_space<vmem>>, %arg5: memref<2x128xf32, #tpu.memory_space<vmem>>, %arg6: memref<128x128xbf16, #tpu.memory_space<vmem>>, %arg7: memref<2x128xf32, #tpu.memory_space<vmem>>, %arg8: memref<32x12xf32, #tpu.memory_space<vmem>>) attributes {dimension_semantics = [#tpu.dimension_semantics<parallel>], iteration_bounds = array<i64: 2>, scalar_prefetch = 0 : i64, scratch_operands = 0 : i64, tpu.core_type = #tpu.core_type<tc>, window_params = [{transform_indices = @transform_0, window_bounds = array<i64: 32, 400>}, {pipeline_mode = #tpu.pipeline_mode<synchronous>, transform_indices = @transform_1, window_bounds = array<i64: 400, 128>}, {pipeline_mode = #tpu.pipeline_mode<synchronous>, transform_indices = @transform_2, window_bounds = array<i64: 2, 128>}, {pipeline_mode = #tpu.pipeline_mode<synchronous>, transform_indices = @transform_3, window_bounds = array<i64: 128, 128>}, {pipeline_mode = #tpu.pipeline_mode<synchronous>, transform_indices = @transform_4, window_bounds = array<i64: 2, 128>}, {pipeline_mode = #tpu.pipeline_mode<synchronous>, transform_indices = @transform_5, window_bounds = array<i64: 128, 128>}, {pipeline_mode = #tpu.pipeline_mode<synchronous>, transform_indices = @transform_6, window_bounds = array<i64: 2, 128>}, {transform_indices = @transform_7, window_bounds = array<i64: 32, 12>}]} {
    %c0 = arith.constant 0 : index
    %c0_0 = arith.constant 0 : index
    %0 = vector.load %arg1[%c0, %c0_0] : memref<32x400xf32, #tpu.memory_space<vmem>>, vector<32x400xf32>
    %1 = arith.truncf %0 : vector<32x400xf32> to vector<32x400xbf16>
    %c0_1 = arith.constant 0 : index
    %c0_2 = arith.constant 0 : index
    %2 = vector.load %arg3[%c0_1, %c0_2] : memref<2x128xf32, #tpu.memory_space<vmem>>, vector<2x128xf32>
    %c0_3 = arith.constant 0 : index
    %c0_4 = arith.constant 0 : index
    %3 = vector.load %arg5[%c0_3, %c0_4] : memref<2x128xf32, #tpu.memory_space<vmem>>, vector<2x128xf32>
    %c0_5 = arith.constant 0 : index
    %c0_6 = arith.constant 0 : index
    %4 = vector.load %arg7[%c0_5, %c0_6] : memref<2x128xf32, #tpu.memory_space<vmem>>, vector<2x128xf32>
    %5 = vector.extract_strided_slice %2 {offsets = [0, 0], sizes = [1, 128], strides = [1, 1]} : vector<2x128xf32> to vector<1x128xf32>
    %6 = vector.extract_strided_slice %2 {offsets = [1, 0], sizes = [1, 128], strides = [1, 1]} : vector<2x128xf32> to vector<1x128xf32>
    %7 = vector.extract_strided_slice %3 {offsets = [0, 0], sizes = [1, 128], strides = [1, 1]} : vector<2x128xf32> to vector<1x128xf32>
    %8 = vector.extract_strided_slice %3 {offsets = [1, 0], sizes = [1, 128], strides = [1, 1]} : vector<2x128xf32> to vector<1x128xf32>
    %9 = vector.extract_strided_slice %4 {offsets = [0, 0], sizes = [1, 128], strides = [1, 1]} : vector<2x128xf32> to vector<1x128xf32>
    %10 = vector.extract_strided_slice %4 {offsets = [1, 0], sizes = [1, 128], strides = [1, 1]} : vector<2x128xf32> to vector<1x128xf32>
    %c0_7 = arith.constant 0 : index
    %c0_8 = arith.constant 0 : index
    %11 = vector.load %arg2[%c0_7, %c0_8] : memref<400x128xbf16, #tpu.memory_space<vmem>>, vector<400x128xbf16>
    %cst = arith.constant dense<0.000000e+00> : vector<32x128xf32>
    %12 = tpu.matmul %1, %11, %cst {dimension_numbers = #tpu.dot_dimension_numbers<[1], [0], [0], [1], [0, 0, 1, 1], [], []>} : vector<32x400xbf16>, vector<400x128xbf16>, vector<32x128xf32> -> vector<32x128xf32>
    %13 = vector.broadcast %5 : vector<1x128xf32> to vector<32x128xf32>
    %14 = arith.addf %12, %13 : vector<32x128xf32>
    %cst_9 = arith.constant 0.000000e+00 : f32
    %15 = vector.broadcast %cst_9 : f32 to vector<32x128xf32>
    %16 = arith.cmpf oge, %14, %15 : vector<32x128xf32>
    %17 = vector.broadcast %6 : vector<1x128xf32> to vector<32x128xf32>
    %18 = arith.mulf %17, %14 : vector<32x128xf32>
    %19 = arith.select %16, %14, %18 : vector<32x128xi1>, vector<32x128xf32>
    %20 = arith.truncf %19 : vector<32x128xf32> to vector<32x128xbf16>
    %c0_10 = arith.constant 0 : index
    %c0_11 = arith.constant 0 : index
    %21 = vector.load %arg4[%c0_10, %c0_11] : memref<128x128xbf16, #tpu.memory_space<vmem>>, vector<128x128xbf16>
    %cst_12 = arith.constant dense<0.000000e+00> : vector<32x128xf32>
    %22 = tpu.matmul %20, %21, %cst_12 {dimension_numbers = #tpu.dot_dimension_numbers<[1], [0], [0], [1], [0, 0, 1, 1], [], []>} : vector<32x128xbf16>, vector<128x128xbf16>, vector<32x128xf32> -> vector<32x128xf32>
    %23 = vector.broadcast %7 : vector<1x128xf32> to vector<32x128xf32>
    %24 = arith.addf %22, %23 : vector<32x128xf32>
    %cst_13 = arith.constant 0.000000e+00 : f32
    %25 = vector.broadcast %cst_13 : f32 to vector<32x128xf32>
    %26 = arith.cmpf oge, %24, %25 : vector<32x128xf32>
    %27 = vector.broadcast %8 : vector<1x128xf32> to vector<32x128xf32>
    %28 = arith.mulf %27, %24 : vector<32x128xf32>
    %29 = arith.select %26, %24, %28 : vector<32x128xi1>, vector<32x128xf32>
    %30 = arith.truncf %29 : vector<32x128xf32> to vector<32x128xbf16>
    %c0_14 = arith.constant 0 : index
    %c0_15 = arith.constant 0 : index
    %31 = vector.load %arg6[%c0_14, %c0_15] : memref<128x128xbf16, #tpu.memory_space<vmem>>, vector<128x128xbf16>
    %cst_16 = arith.constant dense<0.000000e+00> : vector<32x128xf32>
    %32 = tpu.matmul %30, %31, %cst_16 {dimension_numbers = #tpu.dot_dimension_numbers<[1], [0], [0], [1], [0, 0, 1, 1], [], []>} : vector<32x128xbf16>, vector<128x128xbf16>, vector<32x128xf32> -> vector<32x128xf32>
    %33 = vector.broadcast %9 : vector<1x128xf32> to vector<32x128xf32>
    %34 = arith.addf %32, %33 : vector<32x128xf32>
    %cst_17 = arith.constant 0.000000e+00 : f32
    %35 = vector.broadcast %cst_17 : f32 to vector<32x128xf32>
    %36 = arith.cmpf oge, %34, %35 : vector<32x128xf32>
    %37 = vector.broadcast %10 : vector<1x128xf32> to vector<32x128xf32>
    %38 = arith.mulf %37, %34 : vector<32x128xf32>
    %39 = arith.select %36, %34, %38 : vector<32x128xi1>, vector<32x128xf32>
    %40 = arith.addf %39, %19 : vector<32x128xf32>
    %41 = vector.extract_strided_slice %40 {offsets = [0, 0], sizes = [32, 12], strides = [1, 1]} : vector<32x128xf32> to vector<32x12xf32>
    %c0_18 = arith.constant 0 : index
    %c0_19 = arith.constant 0 : index
    %42 = vector.load %arg8[%c0_18, %c0_19] : memref<32x12xf32, #tpu.memory_space<vmem>>, vector<32x12xf32>
    tpu.vector_store %arg8[%c0_18, %c0_19], %41 {strides = array<i32>} : memref<32x12xf32, #tpu.memory_space<vmem>>, vector<32x12xf32>,
    return
  }
  func.func @transform_0(%arg0: i32) -> (i32, i32) {
    %c0_i32 = arith.constant 0 : i32
    %c0_i32_0 = arith.constant 0 : i32
    return %arg0, %c0_i32 : i32, i32
  }
  func.func @transform_1(%arg0: i32) -> (i32, i32) {
    %c0_i32 = arith.constant 0 : i32
    %c0_i32_0 = arith.constant 0 : i32
    %c0_i32_1 = arith.constant 0 : i32
    return %c0_i32, %c0_i32_0 : i32, i32
  }
  func.func @transform_2(%arg0: i32) -> (i32, i32) {
    %c0_i32 = arith.constant 0 : i32
    %c0_i32_0 = arith.constant 0 : i32
    %c0_i32_1 = arith.constant 0 : i32
    return %c0_i32, %c0_i32_0 : i32, i32
  }
  func.func @transform_3(%arg0: i32) -> (i32, i32) {
    %c0_i32 = arith.constant 0 : i32
    %c0_i32_0 = arith.constant 0 : i32
    %c0_i32_1 = arith.constant 0 : i32
    return %c0_i32, %c0_i32_0 : i32, i32
  }
  func.func @transform_4(%arg0: i32) -> (i32, i32) {
    %c0_i32 = arith.constant 0 : i32
    %c0_i32_0 = arith.constant 0 : i32
    %c0_i32_1 = arith.constant 0 : i32
    return %c0_i32, %c0_i32_0 : i32, i32
  }
  func.func @transform_5(%arg0: i32) -> (i32, i32) {
    %c0_i32 = arith.constant 0 : i32
    %c0_i32_0 = arith.constant 0 : i32
    %c0_i32_1 = arith.constant 0 : i32
    return %c0_i32, %c0_i32_0 : i32, i32
  }
  func.func @transform_6(%arg0: i32) -> (i32, i32) {
    %c0_i32 = arith.constant 0 : i32
    %c0_i32_0 = arith.constant 0 : i32
    %c0_i32_1 = arith.constant 0 : i32
    return %c0_i32, %c0_i32_0 : i32, i32
  }
  func.func @transform_7(%arg0: i32) -> (i32, i32) {
    %c0_i32 = arith.constant 0 : i32
    %c0_i32_0 = arith.constant 0 : i32
    return %arg0, %c0_i32 : i32, i32
  }
}

</mosaic_0001>

<bundles_post_ra>
// kernel: tpu_custom_call.1
= control target key start
LH: loop header
LB: loop body
LE: loop exit
PB: predicated region body
PF: predicated region fallthrough
CT: control target
= control target key end

     0   :  { %12 = vsyncpa [#allocation3], 0  ;;  %s1833_s0 = inlined_call_operand.hbm [shape: f32[64,400], index: 0, kind: input, shape index: {}]   ;;  %s1834_s1 = inlined_call_operand.hbm [shape: bf16[400,128], index: 1, kind: input, shape index: {}]   ;;  %s1835_s2 = inlined_call_operand.vmem [shape: f32[2,128], index: 2, kind: input, shape index: {}]   ;;  %s1836_s3 = inlined_call_operand.hbm [shape: bf16[128,128], index: 3, kind: input, shape index: {}]   ;;  %s1837_s4 = inlined_call_operand.vmem [shape: f32[2,128], index: 4, kind: input, shape index: {}]   ;;  %s1838_s5 = inlined_call_operand.hbm [shape: bf16[128,128], index: 5, kind: input, shape index: {}]   ;;  %s1839_s6 = inlined_call_operand.vmem [shape: f32[2,128], index: 6, kind: input, shape index: {}]   ;;  %s1840_s7 = inlined_call_operand.vmem [shape: f32[64,12], index: 7, kind: output, shape index: {}]  }
   0x1   :  { %14 = vsyncpa [#allocation3 + $0x1], 0 }
   0x2   :  { %15 = vsyncpa [#allocation5], 0 }
   0x3   :  { %16 = vsyncpa [#allocation8], 0  ;;  %s1550_s24 = smov 0   ;;  %s1552_s25 = smov 0  }
   0x4   :  { %s1554_s26 = smov 0   ;;  %s1556_s27 = smov 0  }
   0x5 LB: > { %s1074_s28 = sadd.s32 4294967295, %s1499_s27   ;;  %p42_p0 = scmp.ne.s32.totalorder %s1491_s25, %s1487_s24  ;;  %s1499_s27 = sphi %s1556_s27, %s1857_s27   ;;  %s1495_s26 = sphi %s1554_s26, %s1856_s26   ;;  %s1491_s25 = sphi %s1552_s25, %s1855_s25   ;;  %s1487_s24 = sphi %s1550_s24, %s1854_s24  }
   0x6   : > { %p1572_p1 = scmp.eq.s32.totalorder %s1074_s28, 0  ;;  %p1076_p2 = scmp.ge.s32.totalorder %s1499_s27, 1 }
   0x7   : > { %p205_p3 = scmp.lt.s32.totalorder %s1499_s27, 3  ;;  %s1501_s9 = smov [#allocation4]  }
   0x8   : > { %s1845_s29 = scalar_select %p1572_p1, 1, 0 }
   0x9   : > { %p1580_p4 = por %p1572_p1, %p42_p0  ;;  %p1584_p5 = pnand %p1076_p2, %p205_p3 }
   0xa   : > { %s217_s10 = sshll.u32 %s1501_s9, 4  ;;  %s1502_s12 = smov [#allocation6]   ;;  %s1588_s10 = int_to_ptr.vmem [resolvable:$true] %s217_s10 }
   0xb   : > { %s1846_s30 = scalar_select %p1580_p4, 1, 0 }
   0xc   : > { %s1847_s8 = scalar_select %p1584_p5, 1, 0 }
   0xd   : > { %p1241_p6 = pneg %p1584_p5  ;;  %s233_s13 = sshll.u32 %s1502_s12, 4  ;;  %s1598_s13 = int_to_ptr.vmem [resolvable:$true] %s233_s13 }
   0xe   : > { %s1503_s14 = smov [#allocation7]   ;;  %s1343_s18 = scalar_lea.hbm %s1834_s1, 3200 }
   0xf   : > { %p1594_p7 = pnand %p1241_p6, %p1572_p1  ;;  %s1600_s15 = sshll.u32 %s1503_s14, 4  ;;  %s250_s15 = int_to_ptr.vmem [resolvable:$true] %s1600_s15 }
  0x10   : > { %p1344_p8 = scmp.ne.s32.totalorder %s1834_s1, %s1343_s18  ;;  %p1350_p12 = scmp.lt.u32.totalorder %s1343_s18, %s1834_s1 }
  0x11   : > { %p1610_p9 = pneg %p1594_p7 }
  0x13   : > { %p1346_p10 = pnand %p1610_p9, %p1344_p8 }
  0x15   : > { %p1347_p11 = pneg %p1346_p10 }
  0x17   : > { %p1352_p13 = pnand %p1350_p12, %p1347_p11 }
  0x19   : > { %1355 = shalt.err (!%p1352_p13)
}
  0x1a   : > { %s1356_s24 = scalar_lea.vmem %s1588_s10, 3200  ;;  %p1364_p6 = scmp.lt.s32.totalorder %s1588_s10, %s1588_s10 }
  0x1b   : > { %p1357_p0 = scmp.ne.s32.totalorder %s1588_s10, %s1356_s24  ;;  %p1365_p1 = scmp.lt.s32.totalorder %s1356_s24, %s1356_s24 }
  0x1d   : > { %p1359_p2 = pnand %p1357_p0, %p1610_p9  ;;  %p1366_p8 = por %p1365_p1, %p1364_p6 }
  0x1f   : > { %p1360_p3 = pneg %p1359_p2 }
  0x21   : > { %p1367_p10 = pnand %p1366_p8, %p1360_p3 }
  0x23   : > { %1370 = shalt.err (!%p1367_p10)
}
  0x24   : > { %s1504_s9 = smov 64   ;;  %s1505_s12 = smov 4  }
  0x25   : > { %1244 = dma.hbm_to_vmem [thread:$0]  (!%p1594_p7), %s1834_s1, 3200, %s1588_s10, [#allocation5], %s1504_s9, %s1504_s9, %s1505_s12  }
  0x26   : > { %s1371_s19 = scalar_lea.hbm %s1836_s3, 1024 }
  0x27   : > { %p1372_p1 = scmp.ne.s32.totalorder %s1836_s3, %s1371_s19  ;;  %p1378_p13 = scmp.lt.u32.totalorder %s1371_s19, %s1836_s3 }
  0x29   : > { %p1374_p11 = pnand %p1372_p1, %p1610_p9 }
  0x2b   : > { %p1375_p12 = pneg %p1374_p11 }
  0x2d   : > { %p1380_p0 = pnand %p1378_p13, %p1375_p12 }
  0x2f   : > { %1383 = shalt.err (!%p1380_p0)
}
  0x30   : > { %s1384_s10 = scalar_lea.vmem %s1598_s13, 1024  ;;  %p1392_p8 = scmp.lt.s32.totalorder %s1598_s13, %s1598_s13 }
  0x31   : > { %p1385_p2 = scmp.ne.s32.totalorder %s1598_s13, %s1384_s10  ;;  %p1393_p10 = scmp.lt.s32.totalorder %s1384_s10, %s1384_s10 }
  0x33   : > { %p1387_p3 = pnand %p1385_p2, %p1610_p9  ;;  %p1394_p1 = por %p1393_p10, %p1392_p8 }
  0x35   : > { %p1388_p6 = pneg %p1387_p3 }
  0x37   : > { %p1395_p11 = pnand %p1394_p1, %p1388_p6 }
  0x39   : > { %1398 = shalt.err (!%p1395_p11)
}
  0x3a   : > { %1247 = dma.hbm_to_vmem [thread:$0]  (!%p1594_p7), %s1836_s3, 1024, %s1598_s13, [#allocation5], %s1504_s9, %s1504_s9, %s1505_s12  }
  0x3b   : > { %s1399_s19 = scalar_lea.hbm %s1838_s5, 1024 }
  0x3c   : > { %p1400_p12 = scmp.ne.s32.totalorder %s1838_s5, %s1399_s19  ;;  %p1406_p2 = scmp.lt.u32.totalorder %s1399_s19, %s1838_s5 }
  0x3e   : > { %p1402_p13 = pnand %p1400_p12, %p1610_p9 }
  0x40   : > { %p1403_p0 = pneg %p1402_p13 }
  0x42   : > { %p1408_p3 = pnand %p1406_p2, %p1403_p0 }
  0x44   : > { %1411 = shalt.err (!%p1408_p3)
}
  0x45   : > { %s1412_s10 = scalar_lea.vmem %s250_s15, 1024  ;;  %p1420_p1 = scmp.lt.s32.totalorder %s250_s15, %s250_s15 }
  0x46   : > { %p1413_p6 = scmp.ne.s32.totalorder %s250_s15, %s1412_s10  ;;  %p1421_p11 = scmp.lt.s32.totalorder %s1412_s10, %s1412_s10 }
  0x48   : > { %p1415_p8 = pnand %p1413_p6, %p1610_p9  ;;  %p1422_p4 = por %p1421_p11, %p1420_p1 }
  0x4a   : > { %p1416_p10 = pneg %p1415_p8 }
  0x4c   : > { %p1423_p5 = pnand %p1422_p4, %p1416_p10 }
  0x4e   : > { %1426 = shalt.err (!%p1423_p5)
}
  0x4f   : > { %1250 = dma.hbm_to_vmem [thread:$0]  (!%p1594_p7), %s1838_s5, 1024, %s250_s15, [#allocation8], %s1504_s9, %s1504_s9, %s1505_s12  }
  0x50   : > { %s1683_s21 = sadd.s32 1, %s1499_s27   ;;  %s29_s16 = sadd.s32 1, %s1495_s26 }
  0x51   : > { %s26_s11 = ssub.s32 %s1499_s27, %s1683_s21  ;;  %p36_p5 = scmp.ne.s32.totalorder %s1495_s26, %s1491_s25 }
  0x52   : > { %p27_p4 = scmp.eq.s32.totalorder %s26_s11, 0  ;;  %p37_p9 = scmp.eq.s32.totalorder %s1499_s27, 0 }
  0x53   : > { %p1258_p12 = scmp.lt.s32.totalorder %s1499_s27, 2  ;;  %s266_s18 = sand.u32 1, %s1495_s26  }
  0x54   : > { %s1693_s17 = scalar_select %p27_p4, %s1495_s26, %s29_s16  }
  0x55   : > { %p38_p13 = por %p37_p9, %p36_p5  ;;  %s1081_s19 = sshll.u32 %s266_s18, 7 }
  0x56   : > { %s1138_s20 = sshll.u32 %s1499_s27, 11  ;;  %s270_s15 = scalar_lea.vmem [#allocation2], %s1081_s19 }
  0x57   : > { %s1700_s24 = scalar_lea.hbm %s1833_s0, %s1138_s20  ;;  %s278_s9 = sshll.u32 %s270_s15, 4  ;;  %s1702_s9 = int_to_ptr.vmem [resolvable:$true] %s278_s9 }
  0x58   : > { %p1704_p7 = pnand %p1258_p12, %p38_p13  ;;  %s1708_s10 = scalar_lea.sflag [#allocation3], %s266_s18 }
  0x59   : > { %s1427_s13 = scalar_lea.hbm %s1700_s24, 2048  ;;  %s1432_s16 = scalar_lea.hbm %s1833_s0, 4096 }
  0x5a   : > { %p1428_p0 = scmp.ne.s32.totalorder %s1700_s24, %s1427_s13  ;;  %p1429_p2 = pneg %p1704_p7 }
  0x5b   : > { %p1433_p8 = scmp.lt.u32.totalorder %s1700_s24, %s1833_s0  ;;  %p1434_p10 = scmp.lt.u32.totalorder %s1432_s16, %s1427_s13 }
  0x5c   : > { %p1430_p3 = pnand %p1429_p2, %p1428_p0  ;;  %p1436_p11 = scmp.lt.u32.totalorder %s1427_s13, %s1700_s24 }
  0x5d   : > { %p1435_p1 = por %p1434_p10, %p1433_p8 }
  0x5e   : > { %p1431_p6 = pneg %p1430_p3 }
  0x5f   : > { %p1437_p4 = por %p1436_p11, %p1435_p1 }
  0x61   : > { %p1438_p5 = pnand %p1437_p4, %p1431_p6 }
  0x63   : > { %1441 = shalt.err (!%p1438_p5)
}
  0x64   : > { %s1442_s18 = scalar_lea.vmem %s1702_s9, 2048  ;;  %s1506_s22 = smov [#allocation2]  }
  0x65   : > { %p1443_p9 = scmp.ne.s32.totalorder %s1702_s9, %s1442_s18  ;;  %s1447_s23 = sshll.u32 %s1506_s22, 4  ;;  %s1448_s23 = int_to_ptr.vmem [resolvable:$false] %s1447_s23 }
  0x66   : > { %s1449_s15 = scalar_lea.vmem %s1448_s23, 4096  ;;  %p1450_p0 = scmp.lt.s32.totalorder %s1702_s9, %s1448_s23 }
  0x67   : > { %p1445_p12 = pnand %p1443_p9, %p1429_p2  ;;  %p1451_p3 = scmp.lt.s32.totalorder %s1449_s15, %s1442_s18 }
  0x69   : > { %p1446_p13 = pneg %p1445_p12  ;;  %p1452_p8 = por %p1451_p3, %p1450_p0 }
  0x6b   : > { %p1453_p10 = pnand %p1452_p8, %p1446_p13 }
  0x6d   : > { %1456 = shalt.err (!%p1453_p10)
}
  0x6e   : > { %s1507_s13 = smov 512   ;;  %s1508_s14 = smov 32  }
  0x6f   : > { %1254 = dma.hbm_to_vmem [thread:$0]  (!%p1704_p7), %s1700_s24, 2048, %s1702_s9, %s1708_s10, %s1507_s13, %s1507_s13, %s1508_s14  }
  0x70   : > { %p1851_p2 = scmp.ne.s32.totalorder %s1847_s8, 0 }
  0x71   : > { %s292_s11 = sand.u32 (!%p1851_p2), 1, %s1491_s25   ;;  %p1852_p6 = scmp.ne.s32.totalorder (!%p1851_p2), %s1846_s30, 0 }
  0x72   : > { %290 = sbr.rel (%p1851_p2) target bundleno = 841 (0x349), region = 48  ;;  %s1086_s16 = sshll.u32 (!%p1851_p2), %s292_s11, 7 }
  0x73   : > { %s293_s19 = scalar_lea.sflag (!%p1851_p2), [#allocation3], %s292_s11  ;;  %s1739_s20 = scalar_lea.vmem (!%p1851_p2), [#allocation2], %s1086_s16 }
  0x79   : > { %1474 = dma.done.wait (%p1852_p6), %s293_s19, 2048  }
  0x7a   : > { %1476 = vsyncadd (%p1852_p6), %s293_s19, 4294965248  ;;  %p1853_p1 = scmp.ne.s32.totalorder %s1845_s29, 0 }
  0x7c   : > { %1478 = dma.done.wait (%p1853_p1), [#allocation5], 4224  }
  0x7d   : > { %1480 = vsyncadd (%p1853_p1), [#allocation5], 4294963072 }
  0x7e   : > { %1482 = dma.done.wait (%p1853_p1), [#allocation8], 1024  }
  0x7f   : > { %1484 = vsyncadd (%p1853_p1), [#allocation8], 4294966272  ;;  %v1509_v0 = vmov 0   ;;  %v1302_v1 = vld [vmem:[#allocation4 + $0x40] sm:$0xff]   ;;  %v1305_v4 = vld [vmem:[#allocation4 + $0x48] sm:$0xff]   ;;  %vm578_vm0 = vcmask 130048   ;;  %v424_v63 = vlaneseq }
  0x80   : > { %634 = vmatprep.subr.bf16.mxu1 %v1509_v0  ;;  %v1303_v2 = vld [vmem:[#allocation4 + $0x80] sm:$0xff]   ;;  %1139 = vmatprep.subr.bf16.mxu0 %v1302_v1  ;;  %v1306_v5 = vld [vmem:[#allocation4 + $0x88] sm:$0xff]   ;;  %v1308_v7 = vld [vmem:[#allocation4 + $0x50] sm:$0xff]   ;;  %s1090_s9 = sshll.u32 %s1074_s28, 2  ;;  %vm973_vm12 = vcmask 97280  }
  0x81   : > { %v1304_v3 = vld [vmem:[#allocation4] sm:$0xff]   ;;  %635 = vmatpush1.bf16.msra.mxu1 %v1303_v2  ;;  %v1307_v6 = vld [vmem:[#allocation4 + $0x8] sm:$0xff]   ;;  %v1309_v8 = vld [vmem:[#allocation4 + $0x90] sm:$0xff]   ;;  %p341_p7 = scmp.lt.s32.totalorder %s1090_s9, 7 }
  0x82   : > { %1140 = vmatpush3.bf16.msra.mxu0 %v1304_v3  ;;  %636 = vmatprep.subr.bf16.mxu1 %v1509_v0  ;;  %v1310_v9 = vld [vmem:[#allocation4 + $0x10] sm:$0xff]   ;;  %v1311_v10 = vld [vmem:[#allocation4 + $0x58] sm:$0xff]   ;;  %v1314_v13 = vld [vmem:[#allocation4 + $0x60] sm:$0xff]  }
  0x83   : > { %1141 = vmatprep.subr.bf16.mxu0 %v1305_v4  ;;  %v1312_v11 = vld [vmem:[#allocation4 + $0x98] sm:$0xff]   ;;  %v1315_v14 = vld [vmem:[#allocation4 + $0xa0] sm:$0xff]   ;;  %v1317_v16 = vld [vmem:[#allocation4 + $0x68] sm:$0xff]   ;;  %s1859_s9 = smov (!%p341_p7, %s1090_s9), 7 }
  0x84   : > { %v1313_v12 = vld [vmem:[#allocation4 + $0x18] sm:$0xff]   ;;  %v1316_v15 = vld [vmem:[#allocation4 + $0x20] sm:$0xff]   ;;  %v1318_v17 = vld [vmem:[#allocation4 + $0xa8] sm:$0xff]   ;;  %s1091_s18 = sshll.u32 %s1859_s9, 3 }
  0x85   : > { %637 = vmatpush1.bf16.msra.mxu1 %v1306_v5  ;;  %v1319_v18 = vld [vmem:[#allocation4 + $0x28] sm:$0xff]   ;;  %v1320_v19 = vld [vmem:[#allocation4 + $0x70] sm:$0xff]   ;;  %v1323_v24 = vld [vmem:[#allocation4 + $0x78] sm:$0xff]   ;;  %s344_s22 = scalar_lea.vmem %s1840_s7, %s1091_s18 }
  0x86   : > { %1142 = vmatpush3.bf16.msra.mxu0 %v1307_v6  ;;  %638 = vmatprep.subr.bf16.mxu1 %v1509_v0  ;;  %v1321_v20 = vld [vmem:[#allocation4 + $0xb0] sm:$0xff]   ;;  %v348_v22 = vld [vmem:[%s1739_s20 + $0x8] sm:$0xff]  ;;  %v350_v26 = vld [vmem:[%s1739_s20 + $0x18] sm:$0xff] }
  0x87   : > { %1143 = vmatprep.subr.bf16.mxu0 %v1308_v7  ;;  %v1322_v21 = vld [vmem:[#allocation4 + $0x30] sm:$0xff]   ;;  %v352_v23 = vld [vmem:[%s1739_s20 + $0x28] sm:$0xff]  ;;  %v354_v27 = vld [vmem:[%s1739_s20 + $0x38] sm:$0xff] }
  0x88   : > { %v364_v25 = vpack.c.bf16 %v352_v23, %v348_v22  ;;  %v1324_v28 = vld [vmem:[#allocation4 + $0xb8] sm:$0xff]   ;;  %v366_v29 = vpack.c.bf16 %v354_v27, %v350_v26  ;;  %v347_v31 = vld [vmem:[%s1739_s20] sm:$0xff]  ;;  %v349_v34 = vld [vmem:[%s1739_s20 + $0x10] sm:$0xff] }
  0x89   : > { %639 = vmatpush1.bf16.msra.mxu1 %v1309_v8  ;;  %v1325_v30 = vld [vmem:[#allocation4 + $0x38] sm:$0xff]   ;;  %v351_v32 = vld [vmem:[%s1739_s20 + $0x20] sm:$0xff]  ;;  %v353_v35 = vld [vmem:[%s1739_s20 + $0x30] sm:$0xff] }
  0x8a   : > { %1144 = vmatpush3.bf16.msra.mxu0 %v1310_v9  ;;  %640 = vmatprep.subr.bf16.mxu1 %v1509_v0  ;;  %v1326_v33 = vld [vmem:[#allocation4 + $0xc0] sm:$0xff]   ;;  %v356_v36 = vld [vmem:[%s1739_s20 + $0x48] sm:$0xff]  ;;  %v358_v38 = vld [vmem:[%s1739_s20 + $0x58] sm:$0xff]  ;;  %v363_v39 = vpack.c.bf16 %v351_v32, %v347_v31  ;;  %v365_v44 = vpack.c.bf16 %v353_v35, %v349_v34 }
  0x8b   : > { %1145 = vmatprep.subr.bf16.mxu0 %v1311_v10  ;;  %617 = vmatprep.mubr.bf16.mxu0 %v364_v25  ;;  %v360_v37 = vld [vmem:[%s1739_s20 + $0x68] sm:$0xff]  ;;  %v362_v42 = vld [vmem:[%s1739_s20 + $0x78] sm:$0xff]  ;;  %v1328_v43 = vld [vmem:[#allocation6 + $0x8] sm:$0xff]  }
  0x8c   : > { %1117 = vmatprep.mubr.msk.bf16.mxu1 %vm578_vm0, %v366_v29  ;;  %v1327_v40 = vld [vmem:[#allocation6] sm:$0xff]   ;;  %v368_v41 = vpack.c.bf16 %v360_v37, %v356_v36  ;;  %v355_v45 = vld [vmem:[%s1739_s20 + $0x40] sm:$0xff]  ;;  %v370_v47 = vpack.c.bf16 %v362_v42, %v358_v38  ;;  %v1329_v48 = vld [vmem:[#allocation6 + $0x10] sm:$0xff]  }
  0x8d   : > { %641 = vmatpush1.bf16.msra.mxu1 %v1312_v11  ;;  %v359_v46 = vld [vmem:[%s1739_s20 + $0x60] sm:$0xff]  ;;  %v357_v49 = vld [vmem:[%s1739_s20 + $0x50] sm:$0xff]  ;;  %v1331_v54 = vld [vmem:[#allocation6 + $0x20] sm:$0xff]  }
  0x8e   : > { %1146 = vmatpush3.bf16.msra.mxu0 %v1313_v12  ;;  %642 = vmatprep.subr.bf16.mxu1 %v1509_v0  ;;  %v361_v50 = vld [vmem:[%s1739_s20 + $0x70] sm:$0xff]  ;;  %v367_v51 = vpack.c.bf16 %v359_v46, %v355_v45  ;;  %v1330_v53 = vld [vmem:[#allocation6 + $0x18] sm:$0xff]   ;;  %v1333_v56 = vld [vmem:[#allocation6 + $0x30] sm:$0xff]  }
  0x8f   : > { %1147 = vmatprep.subr.bf16.mxu0 %v1314_v13  ;;  %v369_v52 = vpack.c.bf16 %v361_v50, %v357_v49  ;;  %v1332_v55 = vld [vmem:[#allocation6 + $0x28] sm:$0xff]   ;;  %v1334_v57 = vld [vmem:[#allocation6 + $0x38] sm:$0xff]   ;;  %v1335_v58 = vld [vmem:[#allocation7] sm:$0xff]  }
  0x90   : > { %v1336_v59 = vld [vmem:[#allocation7 + $0x8] sm:$0xff]   ;;  %v1337_v60 = vld [vmem:[#allocation7 + $0x10] sm:$0xff]   ;;  %v1338_v61 = vld [vmem:[#allocation7 + $0x18] sm:$0xff]  }
  0x91   : > { %643 = vmatpush1.bf16.msra.mxu1 %v1315_v14  ;;  %v1339_v62 = vld [vmem:[#allocation7 + $0x20] sm:$0xff]   ;;  %v371_v2 = vld [vmem:[%s1835_s2] sm:$0x3]  ;;  %v1341_v45 = vld [vmem:[#allocation7 + $0x30] sm:$0xff]  }
  0x92   : > { %1148 = vmatpush3.bf16.msra.mxu0 %v1316_v15  ;;  %644 = vmatprep.subr.bf16.mxu1 %v1509_v0  ;;  %v1342_v46 = vld [vmem:[#allocation7 + $0x38] sm:$0xff]  }
  0x93   : > { %1149 = vmatprep.subr.bf16.mxu0 %v1317_v16 }
  0x95   : > { %645 = vmatpush1.bf16.msra.mxu1 %v1318_v17 }
  0x96   : > { %1150 = vmatpush3.bf16.msra.mxu0 %v1319_v18  ;;  %646 = vmatprep.subr.bf16.mxu1 %v1509_v0 }
  0x97   : > { %1151 = vmatprep.subr.bf16.mxu0 %v1320_v19 }
  0x99   : > { %647 = vmatpush1.bf16.msra.mxu1 %v1321_v20 }
  0x9a   : > { %1152 = vmatpush3.bf16.msra.mxu0 %v1322_v21  ;;  %648 = vmatprep.subr.bf16.mxu1 %v1509_v0 }
  0x9b   : > { %1153 = vmatprep.subr.bf16.mxu0 %v1323_v24 }
  0x9d   : > { %649 = vmatpush1.bf16.msra.mxu1 %v1324_v28 }
  0x9e   : > { %1154 = vmatpush3.bf16.msra.mxu0 %v1325_v30  ;;  %650 = vmatprep.subr.bf16.mxu1 %v1509_v0  ;;  %v425_v0 = vshrl.u32 %v424_v63, 7 }
  0x9f   : > { %1187 = vmatprep.subr.bf16.mxu0 %v1327_v40 }
  0xa0   : > { %v1780_v1 = vsub.s32 0, %v425_v0  ;;  %v1786_v5 = vsub.s32 1, %v425_v0 }
  0xa1   : > { %618 = vmatmul.mubr.bf16.vlgmr.msra.gmra.mrb[0].mxu0 %v363_v39  ;;  %651 = vmatpush1.bf16.msra.mxu1 %v1326_v33 }
  0xa2   : > { %625 = vmatprep.mubr.bf16.mxu0 %v368_v41  ;;  %1188 = vmatpush3.bf16.msra.mxu0 %v1327_v40  ;;  %v427_v4 = vrot.slane %v371_v2, %v1780_v1  ;;  %v690_v13 = vrot.slane %v371_v2, %v1786_v5 }
  0xa3   : > { %1189 = vmatprep.subr.bf16.mxu0 %v1328_v43  ;;  %1207 = vmatprep.subr.bf16.mxu1 %v1335_v58 }
  0xa4   : > { %667 = vmatmul.mubr.bf16.vlgmr.msra.gmra.mrb[0].mxu1 %v365_v44  ;;  %v1340_v44 = vld [vmem:[#allocation7 + $0x28] sm:$0xff]  }
  0xa5   : > { %1118 = vmatprep.mubr.msk.bf16.mxu1 %vm578_vm0, %v370_v47  ;;  %1208 = vmatpush3.bf16.msra.mxu1 %v1335_v58  ;;  %v372_v47 = vld [vmem:[%s1837_s4] sm:$0x3] }
  0xa6   : > { %1190 = vmatpush3.bf16.msra.mxu0 %v1328_v43  ;;  %1209 = vmatprep.subr.bf16.mxu1 %v1336_v59  ;;  %v825_v49 = vrot.slane %v372_v47, %v1786_v5 }
  0xa7   : > { %1191 = vmatprep.subr.bf16.mxu0 %v1329_v48 }
  0xa9   : > { %626 = vmatmul.mubr.bf16.gmra.mrb[4].mxu0 %v367_v51  ;;  %1210 = vmatpush3.bf16.msra.mxu1 %v1336_v59 }
  0xaa   : > { %1192 = vmatpush3.bf16.msra.mxu0 %v1329_v48  ;;  %1211 = vmatprep.subr.bf16.mxu1 %v1337_v60  ;;  %v720_v48 = vrot.slane %v372_v47, %v1780_v1 }
  0xab   : > { %1193 = vmatprep.subr.bf16.mxu0 %v1330_v53 }
  0xac   : > { %675 = vmatmul.mubr.bf16.gmra.mrb[4].mxu1 %v369_v52 }
  0xad   : > { %1212 = vmatpush3.bf16.msra.mxu1 %v1337_v60 }
  0xae   : > { %1194 = vmatpush3.bf16.msra.mxu0 %v1330_v53  ;;  %1213 = vmatprep.subr.bf16.mxu1 %v1338_v61 }
  0xaf   : > { %1195 = vmatprep.subr.bf16.mxu0 %v1331_v54 }
  0xb1   : > { %1214 = vmatpush3.bf16.msra.mxu1 %v1338_v61 }
  0xb2   : > { %1196 = vmatpush3.bf16.msra.mxu0 %v1331_v54  ;;  %1215 = vmatprep.subr.bf16.mxu1 %v1339_v62 }
  0xb3   : > { %1197 = vmatprep.subr.bf16.mxu0 %v1332_v55 }
  0xb5   : > { %1216 = vmatpush3.bf16.msra.mxu1 %v1339_v62 }
  0xb6   : > { %1198 = vmatpush3.bf16.msra.mxu0 %v1332_v55  ;;  %1217 = vmatprep.subr.bf16.mxu1 %v1340_v44 }
  0xb7   : > { %1199 = vmatprep.subr.bf16.mxu0 %v1333_v56 }
  0xb9   : > { %1218 = vmatpush3.bf16.msra.mxu1 %v1340_v44 }
  0xba   : > { %1200 = vmatpush3.bf16.msra.mxu0 %v1333_v56  ;;  %1219 = vmatprep.subr.bf16.mxu1 %v1341_v45 }
  0xbb   : > { %1201 = vmatprep.subr.bf16.mxu0 %v1334_v57 }
  0xbd   : > { %1220 = vmatpush3.bf16.msra.mxu1 %v1341_v45 }
  0xbe   : > { %1202 = vmatpush3.bf16.msra.mxu0 %v1334_v57  ;;  %1221 = vmatprep.subr.bf16.mxu1 %v1342_v46 }
  0xc1   : > { %1222 = vmatpush3.bf16.msra.mxu1 %v1342_v46 }
 0x174   : > { %v1155_v3 = vpop.f32.mrb[0].mxu0 }
 0x175   : > { %v1156_v6 = vpop.f32.mrb[1].mxu0 }
 0x176   : > { %v1157_v7 = vadd.f32 %v1156_v6, %v1155_v3  ;;  %v1158_v8 = vpop.f32.mrb[2].mxu0  ;;  %v373_v6 = vld [vmem:[%s1839_s6] sm:$0x3] }
 0x177   : > { %v1159_v9 = vpop.f32.mrb[3].mxu0  ;;  %v668_v10 = vpop.f32.mrb[0].mxu1 }
 0x178   : > { %v1160_v11 = vadd.f32 %v1159_v9, %v1158_v8  ;;  %v620_v12 = vadd.f32 %v1157_v7, %v427_v4  ;;  %v670_v14 = vpop.f32.mrb[1].mxu1  ;;  %v855_v7 = vrot.slane %v373_v6, %v1780_v1  ;;  %v960_v8 = vrot.slane %v373_v6, %v1786_v5 }
 0x179   : > { %v671_v15 = vpop.f32.mrb[2].mxu1 }
 0x17a   : > { %v669_v16 = vadd.f32 %v668_v10, %v620_v12  ;;  %v623_v17 = vadd.f32 %v1160_v11, %v427_v4  ;;  %v673_v18 = vpop.f32.mrb[3].mxu1 }
 0x17c   : > { %v691_v19 = vmul.f32 %v690_v13, %v669_v16  ;;  %v672_v20 = vadd.f32 %v671_v15, %v623_v17  ;;  %v1161_v21 = vpop.f32.mrb[4].mxu0  ;;  %vm683_vm1 = vcmp.ge.f32.partialorder %v669_v16, 0.0 }
 0x17d   : > { %v1162_v22 = vpop.f32.mrb[5].mxu0 }
 0x17e   : > { %vm684_vm2 = vcmp.ge.f32.partialorder %v672_v20, 0.0  ;;  %v692_v23 = vmul.f32 %v690_v13, %v672_v20  ;;  %v1163_v24 = vadd.f32 %v1162_v22, %v1161_v21  ;;  %v1164_v25 = vpop.f32.mrb[6].mxu0  ;;  %v1789_v31 = vsel %vm683_vm1, %v669_v16, %v691_v19 }
 0x17f   : > { %v1165_v26 = vpop.f32.mrb[7].mxu0  ;;  %v676_v27 = vpop.f32.mrb[4].mxu1 }
 0x180   : > { %v1166_v28 = vadd.f32 %v1165_v26, %v1164_v25  ;;  %v628_v29 = vadd.f32 %v1163_v24, %v427_v4  ;;  %v678_v30 = vpop.f32.mrb[5].mxu1  ;;  %v1791_v32 = vsel %vm684_vm2, %v672_v20, %v692_v23 }
 0x181   : > { %v679_v33 = vpop.f32.mrb[6].mxu1  ;;  %v699_v34 = vpack.c.bf16 %v1791_v32, %v1789_v31 }
 0x182   : > { %v677_v35 = vadd.f32 %v676_v27, %v628_v29  ;;  %v631_v36 = vadd.f32 %v1166_v28, %v427_v4  ;;  %v681_v37 = vpop.f32.mrb[7].mxu1 }
 0x183   : > { %1203 = vmatprep.mubr.bf16.mxu0 %v699_v34 }
 0x184   : > { %v693_v38 = vmul.f32 %v690_v13, %v677_v35  ;;  %v680_v39 = vadd.f32 %v679_v33, %v631_v36  ;;  %vm685_vm3 = vcmp.ge.f32.partialorder %v677_v35, 0.0 }
 0x186   : > { %vm686_vm4 = vcmp.ge.f32.partialorder %v680_v39, 0.0  ;;  %v694_v40 = vmul.f32 %v690_v13, %v680_v39  ;;  %v1795_v41 = vsel %vm685_vm3, %v677_v35, %v693_v38 }
 0x188   : > { %v1797_v42 = vsel %vm686_vm4, %v680_v39, %v694_v40 }
 0x189   : > { %v700_v43 = vpack.c.bf16 %v1797_v42, %v1795_v41 }
 0x18b   : > { %1204 = vmatmul.mubr.bf16.vlgmr.msra.gmra.mrb[8].mxu0 %v700_v43 }
 0x25e   : > { %v1205_v50 = vpop.f32.mrb[8].mxu0 }
 0x25f   : > { %v812_v51 = vadd.f32 %v1205_v50, %v720_v48  ;;  %v803_v52 = vpop.f32.mrb[9].mxu0 }
 0x260   : > { %v804_v53 = vadd.f32 %v803_v52, %v720_v48  ;;  %v1206_v54 = vpop.f32.mrb[10].mxu0 }
 0x261   : > { %v828_v55 = vmul.f32 %v825_v49, %v812_v51  ;;  %v815_v56 = vadd.f32 %v1206_v54, %v720_v48  ;;  %v806_v57 = vpop.f32.mrb[11].mxu0  ;;  %vm820_vm5 = vcmp.ge.f32.partialorder %v812_v51, 0.0 }
 0x262   : > { %v826_v58 = vmul.f32 %v825_v49, %v804_v53  ;;  %v807_v59 = vadd.f32 %v806_v57, %v720_v48  ;;  %vm818_vm6 = vcmp.ge.f32.partialorder %v804_v53, 0.0 }
 0x263   : > { %vm821_vm7 = vcmp.ge.f32.partialorder %v815_v56, 0.0  ;;  %v829_v60 = vmul.f32 %v825_v49, %v815_v56  ;;  %v832_v62 = vsel %vm820_vm5, %v812_v51, %v828_v55 }
 0x264   : > { %vm819_vm8 = vcmp.ge.f32.partialorder %v807_v59, 0.0  ;;  %v827_v61 = vmul.f32 %v825_v49, %v807_v59  ;;  %v830_v2 = vsel %vm818_vm6, %v804_v53, %v826_v58 }
 0x265   : > { %v833_v63 = vsel %vm821_vm7, %v815_v56, %v829_v60 }
 0x266   : > { %v835_v0 = vpack.c.bf16 %v833_v63, %v832_v62  ;;  %v831_v3 = vsel %vm819_vm8, %v807_v59, %v827_v61 }
 0x267   : > { %v834_v4 = vpack.c.bf16 %v831_v3, %v830_v2 }
 0x269   : > { %1223 = vmatprep.mubr.bf16.mxu1 %v834_v4 }
 0x26a   : > { %1224 = vmatmul.mubr.bf16.vlgmr.msra.gmra.mrb[8].mxu1 %v835_v0 }
 0x33d   : > { %v1225_v9 = vpop.f32.mrb[8].mxu1 }
 0x33e   : > { %v947_v10 = vadd.f32 %v1225_v9, %v855_v7  ;;  %v938_v11 = vpop.f32.mrb[9].mxu1 }
 0x33f   : > { %v939_v12 = vadd.f32 %v938_v11, %v855_v7  ;;  %v1226_v13 = vpop.f32.mrb[10].mxu1 }
 0x340   : > { %v963_v14 = vmul.f32 %v960_v8, %v947_v10  ;;  %v950_v15 = vadd.f32 %v1226_v13, %v855_v7  ;;  %v941_v16 = vpop.f32.mrb[11].mxu1  ;;  %vm955_vm9 = vcmp.ge.f32.partialorder %v947_v10, 0.0 }
 0x341   : > { %vm953_vm10 = vcmp.ge.f32.partialorder %v939_v12, 0.0  ;;  %v961_v17 = vmul.f32 %v960_v8, %v939_v12  ;;  %v942_v18 = vadd.f32 %v941_v16, %v855_v7 }
 0x342   : > { %vm956_vm11 = vcmp.ge.f32.partialorder %v950_v15, 0.0  ;;  %v964_v19 = vmul.f32 %v960_v8, %v950_v15  ;;  %v967_v20 = vsel %vm955_vm9, %v947_v10, %v963_v14 }
 0x343   : > { %v965_v1 = vsel %vm953_vm10, %v939_v12, %v961_v17  ;;  %vm954_vm13 = vcmp.ge.f32.partialorder %v942_v18, 0.0  ;;  %v962_v5 = vmul.f32 %v960_v8, %v942_v18  ;;  %v971_v25 = vadd.f32 %v967_v20, %v1795_v41 }
 0x344   : > { %v969_v21 = vadd.f32 %v965_v1, %v1789_v31  ;;  %v968_v22 = vsel %vm956_vm11, %v950_v15, %v964_v19 }
 0x345   : > { %v966_v23 = vsel %vm954_vm13, %v942_v18, %v962_v5  ;;  %v972_v26 = vadd.f32 %v968_v22, %v1797_v42  ;;  %976 = vst.msk [vmem:[%s344_s22 + $0x10] sm:$0xff] %vm973_vm12, %v971_v25 }
 0x346   : > { %974 = vst.msk [vmem:[%s344_s22] sm:$0xff] %vm973_vm12, %v969_v21  ;;  %v970_v24 = vadd.f32 %v966_v23, %v1791_v32 }
 0x347   : > { %977 = vst.msk [vmem:[%s344_s22 + $0x18] sm:$0xff] %vm973_vm12, %v972_v26 }
 0x348   : > { %975 = vst.msk [vmem:[%s344_s22 + $0x8] sm:$0xff] %vm973_vm12, %v970_v24 }
 0x349 PF: > { %p19_p11 = scmp.ge.s32.totalorder %s1683_s21, 4   ;;  %s1854_s24 = smov %s1491_s25 }
 0x34a   : > { %s1855_s25 = smov %s1495_s26  ;;  %s1856_s26 = smov %s1693_s17 }
 0x34b   : > { %s1857_s27 = smov %s1683_s21  ;;  %21 = sbr.rel (!%p19_p11) target bundleno = 5 (0x5), region = 100 }
 0x352   :  { %1000 = vsyncpa [#allocation3], 1 }
 0x353   :  { %1002 = vsyncpa [#allocation3 + $0x1], 1 }
 0x354   :  { %1003 = vsyncpa [#allocation5], 1 }
 0x355   :  { %1004 = vsyncpa [#allocation8], 1 }

</bundles_post_ra>
